<compile_context>
chip_gen: v5e
topology: v5e:2x2
jax: 0.10.0
libtpu: 0.0.40
codegen_flags: <defaults>
</compile_context>

<pallas_src>
import jax
import jax.numpy as jnp
from jax import lax
from jax.experimental import pallas as pl
from jax.experimental.pallas import tpu as pltpu

DIM_AUD = 76
OUT_PAD = 128          # lane-dense padded width of the final Linear output
WIN_SIZE = 16
ALPHA = 0.02           # LeakyReLU negative slope
CHUNK = 64             # windows processed per in-kernel sub-chunk


def _leaky(v):
    # LeakyReLU(0.02): for 0 < alpha < 1, max(v, alpha*v) == where(v>=0, v, alpha*v).
    return jnp.maximum(v, ALPHA * v)


def _mm(op, w_ref, b_ref):
    """(rows, K) x (K, C_out) on the MXU: bf16 operands, f32 accumulate, f32 bias."""
    return jnp.dot(op.astype(jnp.bfloat16), w_ref[...],
                   preferred_element_type=jnp.float32) + b_ref[...]


def _conv_fused(h, w_ref, b_ref):
    """Conv1d(kernel=3, stride=2, padding=1) + bias + LeakyReLU on (N, L, C).

    out[t] = W0 @ in[2t-1] + W1 @ in[2t] + W2 @ in[2t+1]   (in[-1] == 0)

    The taps are fused along K into a single matmul: the operand row for output
    step t is [in[2t-1] || in[2t] || in[2t+1]].  When L_out == 1 (conv4) tap 0
    always reads the zero pad, so w_ref holds only taps 1-2 (K = 2*C) and the
    operand is [in[0] || in[1]].
    """
    N, L_in, C = h.shape
    L_out = L_in // 2
    C_out = w_ref.shape[-1]

    hp = h.reshape(N, L_out, 2, C)
    even = hp[:, :, 0, :]                      # in[2t]
    odd = hp[:, :, 1, :]                       # in[2t+1]
    if L_out == 1:
        op = jnp.concatenate([even, odd], axis=-1)              # (N, 1, 2C)
    else:
        odd_m1 = jnp.concatenate(                               # in[2t-1]
            [jnp.zeros((N, 1, C), h.dtype), odd[:, :L_out - 1, :]], axis=1)
        op = jnp.concatenate([odd_m1, even, odd], axis=-1)      # (N, L_out, 3C)

    out = _leaky(_mm(op.reshape(N * L_out, op.shape[-1]), w_ref, b_ref))
    return out.reshape(N, L_out, C_out)


def audionet_kernel(x_ref,
                    w1_ref, b1_ref, w2_ref, b2_ref,
                    w3_ref, b3_ref, w4_ref, b4_ref,
                    fw1_ref, fb1_ref, fw2_ref, fb2_ref,
                    out_ref):
    TB = x_ref.shape[0]
    K1 = x_ref.shape[-1]              # 3 * 29 = 87 (conv1 already im2col'd)

    def forward(x):                   # x: (n, 8, 87) bf16
        n = x.shape[0]
        h = _leaky(_mm(x.reshape(n * 8, K1), w1_ref, b1_ref))   # (n*8, 32)
        h = h.reshape(n, 8, 32)
        h = _conv_fused(h, w2_ref, b2_ref)                      # (n, 4, 32)
        h = _conv_fused(h, w3_ref, b3_ref)                      # (n, 2, 64)
        h = _conv_fused(h, w4_ref, b4_ref)                      # (n, 1, 64)
        h = h.reshape(n, 64)
        h = _leaky(_mm(h, fw1_ref, fb1_ref))                    # (n, 64)
        return _mm(h, fw2_ref, fb2_ref)                         # (n, 128) f32

    if TB <= CHUNK:
        out_ref[...] = forward(x_ref[...])
    else:
        # TB is a multiple of CHUNK (enforced in the wrapper).  Sub-chunking
        # keeps each layer's intermediates to a few dozen vregs instead of
        # large compiler-materialized VMEM temporaries.
        def body(c, carry):
            s = pl.multiple_of(c * CHUNK, CHUNK)
            out_ref[pl.ds(s, CHUNK), :] = forward(x_ref[pl.ds(s, CHUNK), :, :])
            return carry
        lax.fori_loop(0, TB // CHUNK, body, 0)


def make_params(key):
    """Deterministic synthetic parameters, PyTorch layouts:
       conv weight (C_out, C_in, K), linear weight (out, in)."""
    keys = jax.random.split(key, 12)

    def init(k, shape, scale=0.1):
        return jax.random.normal(k, shape, jnp.float32) * scale

    return {
        "w1": init(keys[0], (32, 29, 3)), "b1": init(keys[1], (32,)),
        "w2": init(keys[2], (32, 32, 3)), "b2": init(keys[3], (32,)),
        "w3": init(keys[4], (64, 32, 3)), "b3": init(keys[5], (64,)),
        "w4": init(keys[6], (64, 64, 3)), "b4": init(keys[7], (64,)),
        "fw1": init(keys[8], (64, 64)), "fb1": init(keys[9], (64,)),
        "fw2": init(keys[10], (DIM_AUD, 64)), "fb2": init(keys[11], (DIM_AUD,)),
    }


def prepare_params(params):
    """One-time re-layout of PyTorch-style params for the kernel.

    Conv weights (C_out, C_in, 3) -> tap-fused (3*C_in, C_out) bf16 (conv4:
    (2*C_in, C_out), tap 0 dropped since it only reads the zero pad).
    Linear weights (out, in) -> (in, out) bf16.  Biases -> (1, C) f32.
    Final layer zero-padded to 128 output lanes for a lane-dense store.
    """
    bf16, f32 = jnp.bfloat16, jnp.float32

    def fuse3(w):
        wt = jnp.transpose(w, (2, 1, 0))                   # (3, C_in, C_out)
        return wt.reshape(3 * w.shape[1], w.shape[0]).astype(bf16)

    def fuse2(w):                                          # taps 1, 2 only
        wt = jnp.transpose(w, (2, 1, 0))[1:]
        return wt.reshape(2 * w.shape[1], w.shape[0]).astype(bf16)

    def bias_row(b):
        return b[None, :].astype(f32)

    fw2_p = jnp.zeros((64, OUT_PAD), bf16).at[:, :DIM_AUD].set(
        params["fw2"].T.astype(bf16))
    fb2_p = jnp.zeros((1, OUT_PAD), f32).at[:, :DIM_AUD].set(
        params["fb2"][None, :].astype(f32))

    return (
        fuse3(params["w1"]), bias_row(params["b1"]),
        fuse3(params["w2"]), bias_row(params["b2"]),
        fuse3(params["w3"]), bias_row(params["b3"]),
        fuse2(params["w4"]), bias_row(params["b4"]),
        params["fw1"].T.astype(bf16), bias_row(params["fb1"]),
        fw2_p, fb2_p,
    )


def _round_up(v, m):
    return ((v + m - 1) // m) * m


def audionet_forward(x, prepped, *, batch_tile=512):
    B = x.shape[0]
    half_w = WIN_SIZE // 2
    xw = x[:, 8 - half_w:8 + half_w, :].astype(jnp.float32)      # (B, 16, C_in)
    C_in = xw.shape[-1]

    # conv1 im2col in XLA (off the kernel's critical path): row for output step
    # t is [in[2t-1] || in[2t] || in[2t+1]], matching the tap-fused conv1 weight.
    even = xw[:, 0::2, :]                                        # in[2t]
    odd = xw[:, 1::2, :]                                         # in[2t+1]
    odd_m1 = jnp.concatenate(
        [jnp.zeros((B, 1, C_in), xw.dtype), odd[:, :-1, :]], axis=1)
    x_pack = jnp.concatenate([odd_m1, even, odd],
                             axis=-1).astype(jnp.bfloat16)       # (B, 8, 3*C_in)

    # Batch tiling: >= 2 grid steps whenever B > CHUNK (v7x uses both TCs);
    # tiles are multiples of CHUNK so the in-kernel sub-chunk loop divides evenly.
    if B <= CHUNK:
        TB, B_pad = B, B
    else:
        n_steps = max(2, pl.cdiv(B, batch_tile))
        TB = min(_round_up(pl.cdiv(B, n_steps), CHUNK),
                 _round_up(batch_tile, CHUNK))
        B_pad = _round_up(B, TB)
        x_pack = jnp.pad(x_pack, ((0, B_pad - B), (0, 0), (0, 0)))
    grid = (B_pad // TB,)

    def const_spec(p):
        return pl.BlockSpec(p.shape, lambda i: (0, 0))

    out = pl.pallas_call(
        audionet_kernel,
        out_shape=jax.ShapeDtypeStruct((B_pad, OUT_PAD), jnp.float32),
        grid=grid,
        in_specs=[pl.BlockSpec((TB, half_w, 3 * C_in), lambda i: (i, 0, 0))]
                 + [const_spec(p) for p in prepped],
        out_specs=pl.BlockSpec((TB, OUT_PAD), lambda i: (i, 0)),
        compiler_params=pltpu.CompilerParams(
            dimension_semantics=("parallel",)),
    )(x_pack, *prepped)

    return jnp.squeeze(out[:B, :DIM_AUD])      # matches torch `.squeeze()`


def audionet_reference(x, params):
    """Pure-JAX (f32) reference mirroring the PyTorch forward exactly."""
    half_w = WIN_SIZE // 2
    h = jnp.transpose(x[:, 8 - half_w:8 + half_w, :], (0, 2, 1))  # (B, 29, 16)
    for wn, bn in (("w1", "b1"), ("w2", "b2"), ("w3", "b3"), ("w4", "b4")):
        h = lax.conv_general_dilated(
            h, params[wn], window_strides=(2,), padding=[(1, 1)],
            dimension_numbers=("NCH", "OIH", "NCH"))
        h = jnp.where(h + params[bn][None, :, None] >= 0,
                      h + params[bn][None, :, None],
                      ALPHA * (h + params[bn][None, :, None]))
    h = h[:, :, 0]                                                # squeeze(-1)
    h = jnp.where(h @ params["fw1"].T + params["fb1"] >= 0,
                  h @ params["fw1"].T + params["fb1"],
                  ALPHA * (h @ params["fw1"].T + params["fb1"]))
    h = h @ params["fw2"].T + params["fb2"]
    return jnp.squeeze(h)


if __name__ == "__main__":
    key = jax.random.PRNGKey(0)
    kx, kp = jax.random.split(key)
    params = make_params(kp)
    prepped = prepare_params(params)          # one-time weight re-layout

    # Small batch: single grid step, single in-kernel chunk.
    B = 2
    x = jax.random.normal(kx, (B, WIN_SIZE, 29), jnp.float32)
    out = jax.block_until_ready(audionet_forward(x, prepped))
    ref = audionet_reference(x, params)
    assert out.shape == (B, DIM_AUD), out.shape
    err = float(jnp.max(jnp.abs(out - ref)))
    # bf16 MXU operands -> relaxed tolerance vs the f32 reference.
    assert jnp.allclose(out, ref, atol=5e-2, rtol=5e-2), f"max abs err {err}"

    # Larger batch exercises the multi-grid-step + sub-chunked path.
    B2 = 200
    x2 = jax.random.normal(jax.random.PRNGKey(1), (B2, WIN_SIZE, 29), jnp.float32)
    out2 = jax.block_until_ready(audionet_forward(x2, prepped))
    ref2 = audionet_reference(x2, params)
    assert out2.shape == (B2, DIM_AUD), out2.shape
    err2 = float(jnp.max(jnp.abs(out2 - ref2)))
    assert jnp.allclose(out2, ref2, atol=5e-2, rtol=5e-2), f"max abs err {err2}"

    print("KERNEL_OK")
</pallas_src>

<mosaic_0001>
module attributes {stable_mosaic.version = 11 : i64} {
  func.func @audionet_kernel(%arg0: i32, %arg1: memref<2x8x87xbf16, #tpu.memory_space<vmem>>, %arg2: memref<87x32xbf16, #tpu.memory_space<vmem>>, %arg3: memref<1x32xf32, #tpu.memory_space<vmem>>, %arg4: memref<96x32xbf16, #tpu.memory_space<vmem>>, %arg5: memref<1x32xf32, #tpu.memory_space<vmem>>, %arg6: memref<96x64xbf16, #tpu.memory_space<vmem>>, %arg7: memref<1x64xf32, #tpu.memory_space<vmem>>, %arg8: memref<128x64xbf16, #tpu.memory_space<vmem>>, %arg9: memref<1x64xf32, #tpu.memory_space<vmem>>, %arg10: memref<64x64xbf16, #tpu.memory_space<vmem>>, %arg11: memref<1x64xf32, #tpu.memory_space<vmem>>, %arg12: memref<64x128xbf16, #tpu.memory_space<vmem>>, %arg13: memref<1x128xf32, #tpu.memory_space<vmem>>, %arg14: memref<2x128xf32, #tpu.memory_space<vmem>>) attributes {dimension_semantics = [#tpu.dimension_semantics<parallel>], iteration_bounds = array<i64: 1>, scalar_prefetch = 0 : i64, scratch_operands = 0 : i64, tpu.core_type = #tpu.core_type<tc>, window_params = [{transform_indices = @transform_0, window_bounds = array<i64: 2, 8, 87>}, {pipeline_mode = #tpu.pipeline_mode<synchronous>, transform_indices = @transform_1, window_bounds = array<i64: 87, 32>}, {pipeline_mode = #tpu.pipeline_mode<synchronous>, transform_indices = @transform_2, window_bounds = array<i64: 1, 32>}, {pipeline_mode = #tpu.pipeline_mode<synchronous>, transform_indices = @transform_3, window_bounds = array<i64: 96, 32>}, {pipeline_mode = #tpu.pipeline_mode<synchronous>, transform_indices = @transform_4, window_bounds = array<i64: 1, 32>}, {pipeline_mode = #tpu.pipeline_mode<synchronous>, transform_indices = @transform_5, window_bounds = array<i64: 96, 64>}, {pipeline_mode = #tpu.pipeline_mode<synchronous>, transform_indices = @transform_6, window_bounds = array<i64: 1, 64>}, {pipeline_mode = #tpu.pipeline_mode<synchronous>, transform_indices = @transform_7, window_bounds = array<i64: 128, 64>}, {pipeline_mode = #tpu.pipeline_mode<synchronous>, transform_indices = @transform_8, window_bounds = array<i64: 1, 64>}, {pipeline_mode = #tpu.pipeline_mode<synchronous>, transform_indices = @transform_9, window_bounds = array<i64: 64, 64>}, {pipeline_mode = #tpu.pipeline_mode<synchronous>, transform_indices = @transform_10, window_bounds = array<i64: 1, 64>}, {pipeline_mode = #tpu.pipeline_mode<synchronous>, transform_indices = @transform_11, window_bounds = array<i64: 64, 128>}, {pipeline_mode = #tpu.pipeline_mode<synchronous>, transform_indices = @transform_12, window_bounds = array<i64: 1, 128>}, {transform_indices = @transform_13, window_bounds = array<i64: 2, 128>}]} {
    %c0 = arith.constant 0 : index
    %c0_0 = arith.constant 0 : index
    %c0_1 = arith.constant 0 : index
    %0 = vector.load %arg1[%c0, %c0_0, %c0_1] : memref<2x8x87xbf16, #tpu.memory_space<vmem>>, vector<2x8x87xbf16>
    %1 = vector.shape_cast %0 : vector<2x8x87xbf16> to vector<16x87xbf16>
    %c0_2 = arith.constant 0 : index
    %c0_3 = arith.constant 0 : index
    %2 = vector.load %arg2[%c0_2, %c0_3] : memref<87x32xbf16, #tpu.memory_space<vmem>>, vector<87x32xbf16>
    %cst = arith.constant dense<0.000000e+00> : vector<16x32xf32>
    %3 = tpu.matmul %1, %2, %cst {dimension_numbers = #tpu.dot_dimension_numbers<[1], [0], [0], [1], [0, 0, 1, 1], [], []>} : vector<16x87xbf16>, vector<87x32xbf16>, vector<16x32xf32> -> vector<16x32xf32>
    %c0_4 = arith.constant 0 : index
    %c0_5 = arith.constant 0 : index
    %4 = vector.load %arg3[%c0_4, %c0_5] : memref<1x32xf32, #tpu.memory_space<vmem>>, vector<1x32xf32>
    %5 = vector.broadcast %4 : vector<1x32xf32> to vector<16x32xf32>
    %6 = arith.addf %3, %5 : vector<16x32xf32>
    %cst_6 = arith.constant 2.000000e-02 : f32
    %7 = vector.broadcast %cst_6 : f32 to vector<16x32xf32>
    %8 = arith.mulf %7, %6 : vector<16x32xf32>
    %9 = arith.maximumf %6, %8 : vector<16x32xf32>
    %10 = vector.shape_cast %9 : vector<16x32xf32> to vector<2x8x32xf32>
    %11 = vector.shape_cast %10 : vector<2x8x32xf32> to vector<2x4x2x32xf32>
    %12 = vector.extract_strided_slice %11 {offsets = [0, 0, 0, 0], sizes = [2, 4, 1, 32], strides = [1, 1, 1, 1]} : vector<2x4x2x32xf32> to vector<2x4x1x32xf32>
    %13 = vector.shape_cast %12 : vector<2x4x1x32xf32> to vector<2x4x32xf32>
    %14 = vector.extract_strided_slice %11 {offsets = [0, 0, 1, 0], sizes = [2, 4, 1, 32], strides = [1, 1, 1, 1]} : vector<2x4x2x32xf32> to vector<2x4x1x32xf32>
    %15 = vector.shape_cast %14 : vector<2x4x1x32xf32> to vector<2x4x32xf32>
    %cst_7 = arith.constant 0.000000e+00 : f32
    %16 = vector.broadcast %cst_7 : f32 to vector<2x1x32xf32>
    %17 = vector.extract_strided_slice %15 {offsets = [0, 0, 0], sizes = [2, 3, 32], strides = [1, 1, 1]} : vector<2x4x32xf32> to vector<2x3x32xf32>
    %18 = tpu.concatenate %16, %17 in 1 : vector<2x1x32xf32>, vector<2x3x32xf32> -> vector<2x4x32xf32>
    %19 = tpu.concatenate %18, %13, %15 in 2 : vector<2x4x32xf32>, vector<2x4x32xf32>, vector<2x4x32xf32> -> vector<2x4x96xf32>
    %20 = vector.shape_cast %19 : vector<2x4x96xf32> to vector<8x96xf32>
    %21 = arith.truncf %20 : vector<8x96xf32> to vector<8x96xbf16>
    %c0_8 = arith.constant 0 : index
    %c0_9 = arith.constant 0 : index
    %22 = vector.load %arg4[%c0_8, %c0_9] : memref<96x32xbf16, #tpu.memory_space<vmem>>, vector<96x32xbf16>
    %cst_10 = arith.constant dense<0.000000e+00> : vector<8x32xf32>
    %23 = tpu.matmul %21, %22, %cst_10 {dimension_numbers = #tpu.dot_dimension_numbers<[1], [0], [0], [1], [0, 0, 1, 1], [], []>} : vector<8x96xbf16>, vector<96x32xbf16>, vector<8x32xf32> -> vector<8x32xf32>
    %c0_11 = arith.constant 0 : index
    %c0_12 = arith.constant 0 : index
    %24 = vector.load %arg5[%c0_11, %c0_12] : memref<1x32xf32, #tpu.memory_space<vmem>>, vector<1x32xf32>
    %25 = vector.broadcast %24 : vector<1x32xf32> to vector<8x32xf32>
    %26 = arith.addf %23, %25 : vector<8x32xf32>
    %cst_13 = arith.constant 2.000000e-02 : f32
    %27 = vector.broadcast %cst_13 : f32 to vector<8x32xf32>
    %28 = arith.mulf %27, %26 : vector<8x32xf32>
    %29 = arith.maximumf %26, %28 : vector<8x32xf32>
    %30 = vector.shape_cast %29 : vector<8x32xf32> to vector<2x4x32xf32>
    %31 = vector.shape_cast %30 : vector<2x4x32xf32> to vector<2x2x2x32xf32>
    %32 = vector.extract_strided_slice %31 {offsets = [0, 0, 0, 0], sizes = [2, 2, 1, 32], strides = [1, 1, 1, 1]} : vector<2x2x2x32xf32> to vector<2x2x1x32xf32>
    %33 = vector.shape_cast %32 : vector<2x2x1x32xf32> to vector<2x2x32xf32>
    %34 = vector.extract_strided_slice %31 {offsets = [0, 0, 1, 0], sizes = [2, 2, 1, 32], strides = [1, 1, 1, 1]} : vector<2x2x2x32xf32> to vector<2x2x1x32xf32>
    %35 = vector.shape_cast %34 : vector<2x2x1x32xf32> to vector<2x2x32xf32>
    %cst_14 = arith.constant 0.000000e+00 : f32
    %36 = vector.broadcast %cst_14 : f32 to vector<2x1x32xf32>
    %37 = vector.extract_strided_slice %35 {offsets = [0, 0, 0], sizes = [2, 1, 32], strides = [1, 1, 1]} : vector<2x2x32xf32> to vector<2x1x32xf32>
    %38 = tpu.concatenate %36, %37 in 1 : vector<2x1x32xf32>, vector<2x1x32xf32> -> vector<2x2x32xf32>
    %39 = tpu.concatenate %38, %33, %35 in 2 : vector<2x2x32xf32>, vector<2x2x32xf32>, vector<2x2x32xf32> -> vector<2x2x96xf32>
    %40 = vector.shape_cast %39 : vector<2x2x96xf32> to vector<4x96xf32>
    %41 = arith.truncf %40 : vector<4x96xf32> to vector<4x96xbf16>
    %c0_15 = arith.constant 0 : index
    %c0_16 = arith.constant 0 : index
    %42 = vector.load %arg6[%c0_15, %c0_16] : memref<96x64xbf16, #tpu.memory_space<vmem>>, vector<96x64xbf16>
    %cst_17 = arith.constant dense<0.000000e+00> : vector<4x64xf32>
    %43 = tpu.matmul %41, %42, %cst_17 {dimension_numbers = #tpu.dot_dimension_numbers<[1], [0], [0], [1], [0, 0, 1, 1], [], []>} : vector<4x96xbf16>, vector<96x64xbf16>, vector<4x64xf32> -> vector<4x64xf32>
    %c0_18 = arith.constant 0 : index
    %c0_19 = arith.constant 0 : index
    %44 = vector.load %arg7[%c0_18, %c0_19] : memref<1x64xf32, #tpu.memory_space<vmem>>, vector<1x64xf32>
    %45 = vector.broadcast %44 : vector<1x64xf32> to vector<4x64xf32>
    %46 = arith.addf %43, %45 : vector<4x64xf32>
    %cst_20 = arith.constant 2.000000e-02 : f32
    %47 = vector.broadcast %cst_20 : f32 to vector<4x64xf32>
    %48 = arith.mulf %47, %46 : vector<4x64xf32>
    %49 = arith.maximumf %46, %48 : vector<4x64xf32>
    %50 = vector.shape_cast %49 : vector<4x64xf32> to vector<2x2x64xf32>
    %51 = vector.shape_cast %50 : vector<2x2x64xf32> to vector<2x1x2x64xf32>
    %52 = vector.extract_strided_slice %51 {offsets = [0, 0, 0, 0], sizes = [2, 1, 1, 64], strides = [1, 1, 1, 1]} : vector<2x1x2x64xf32> to vector<2x1x1x64xf32>
    %53 = vector.shape_cast %52 : vector<2x1x1x64xf32> to vector<2x1x64xf32>
    %54 = vector.extract_strided_slice %51 {offsets = [0, 0, 1, 0], sizes = [2, 1, 1, 64], strides = [1, 1, 1, 1]} : vector<2x1x2x64xf32> to vector<2x1x1x64xf32>
    %55 = vector.shape_cast %54 : vector<2x1x1x64xf32> to vector<2x1x64xf32>
    %56 = tpu.concatenate %53, %55 in 2 : vector<2x1x64xf32>, vector<2x1x64xf32> -> vector<2x1x128xf32>
    %57 = vector.shape_cast %56 : vector<2x1x128xf32> to vector<2x128xf32>
    %58 = arith.truncf %57 : vector<2x128xf32> to vector<2x128xbf16>
    %c0_21 = arith.constant 0 : index
    %c0_22 = arith.constant 0 : index
    %59 = vector.load %arg8[%c0_21, %c0_22] : memref<128x64xbf16, #tpu.memory_space<vmem>>, vector<128x64xbf16>
    %cst_23 = arith.constant dense<0.000000e+00> : vector<2x64xf32>
    %60 = tpu.matmul %58, %59, %cst_23 {dimension_numbers = #tpu.dot_dimension_numbers<[1], [0], [0], [1], [0, 0, 1, 1], [], []>} : vector<2x128xbf16>, vector<128x64xbf16>, vector<2x64xf32> -> vector<2x64xf32>
    %c0_24 = arith.constant 0 : index
    %c0_25 = arith.constant 0 : index
    %61 = vector.load %arg9[%c0_24, %c0_25] : memref<1x64xf32, #tpu.memory_space<vmem>>, vector<1x64xf32>
    %62 = vector.broadcast %61 : vector<1x64xf32> to vector<2x64xf32>
    %63 = arith.addf %60, %62 : vector<2x64xf32>
    %cst_26 = arith.constant 2.000000e-02 : f32
    %64 = vector.broadcast %cst_26 : f32 to vector<2x64xf32>
    %65 = arith.mulf %64, %63 : vector<2x64xf32>
    %66 = arith.maximumf %63, %65 : vector<2x64xf32>
    %67 = vector.shape_cast %66 : vector<2x64xf32> to vector<2x1x64xf32>
    %68 = vector.shape_cast %67 : vector<2x1x64xf32> to vector<2x64xf32>
    %69 = arith.truncf %68 : vector<2x64xf32> to vector<2x64xbf16>
    %c0_27 = arith.constant 0 : index
    %c0_28 = arith.constant 0 : index
    %70 = vector.load %arg10[%c0_27, %c0_28] : memref<64x64xbf16, #tpu.memory_space<vmem>>, vector<64x64xbf16>
    %cst_29 = arith.constant dense<0.000000e+00> : vector<2x64xf32>
    %71 = tpu.matmul %69, %70, %cst_29 {dimension_numbers = #tpu.dot_dimension_numbers<[1], [0], [0], [1], [0, 0, 1, 1], [], []>} : vector<2x64xbf16>, vector<64x64xbf16>, vector<2x64xf32> -> vector<2x64xf32>
    %c0_30 = arith.constant 0 : index
    %c0_31 = arith.constant 0 : index
    %72 = vector.load %arg11[%c0_30, %c0_31] : memref<1x64xf32, #tpu.memory_space<vmem>>, vector<1x64xf32>
    %73 = vector.broadcast %72 : vector<1x64xf32> to vector<2x64xf32>
    %74 = arith.addf %71, %73 : vector<2x64xf32>
    %cst_32 = arith.constant 2.000000e-02 : f32
    %75 = vector.broadcast %cst_32 : f32 to vector<2x64xf32>
    %76 = arith.mulf %75, %74 : vector<2x64xf32>
    %77 = arith.maximumf %74, %76 : vector<2x64xf32>
    %78 = arith.truncf %77 : vector<2x64xf32> to vector<2x64xbf16>
    %c0_33 = arith.constant 0 : index
    %c0_34 = arith.constant 0 : index
    %79 = vector.load %arg12[%c0_33, %c0_34] : memref<64x128xbf16, #tpu.memory_space<vmem>>, vector<64x128xbf16>
    %cst_35 = arith.constant dense<0.000000e+00> : vector<2x128xf32>
    %80 = tpu.matmul %78, %79, %cst_35 {dimension_numbers = #tpu.dot_dimension_numbers<[1], [0], [0], [1], [0, 0, 1, 1], [], []>} : vector<2x64xbf16>, vector<64x128xbf16>, vector<2x128xf32> -> vector<2x128xf32>
    %c0_36 = arith.constant 0 : index
    %c0_37 = arith.constant 0 : index
    %81 = vector.load %arg13[%c0_36, %c0_37] : memref<1x128xf32, #tpu.memory_space<vmem>>, vector<1x128xf32>
    %82 = vector.broadcast %81 : vector<1x128xf32> to vector<2x128xf32>
    %83 = arith.addf %80, %82 : vector<2x128xf32>
    %c0_38 = arith.constant 0 : index
    %c0_39 = arith.constant 0 : index
    %84 = vector.load %arg14[%c0_38, %c0_39] : memref<2x128xf32, #tpu.memory_space<vmem>>, vector<2x128xf32>
    tpu.vector_store %arg14[%c0_38, %c0_39], %83 {strides = array<i32>} : memref<2x128xf32, #tpu.memory_space<vmem>>, vector<2x128xf32>,
    return
  }
  func.func @transform_0(%arg0: i32) -> (i32, i32, i32) {
    %c0_i32 = arith.constant 0 : i32
    %c0_i32_0 = arith.constant 0 : i32
    %c0_i32_1 = arith.constant 0 : i32
    return %arg0, %c0_i32, %c0_i32_0 : i32, i32, i32
  }
  func.func @transform_1(%arg0: i32) -> (i32, i32) {
    %c0_i32 = arith.constant 0 : i32
    %c0_i32_0 = arith.constant 0 : i32
    %c0_i32_1 = arith.constant 0 : i32
    return %c0_i32, %c0_i32_0 : i32, i32
  }
  func.func @transform_2(%arg0: i32) -> (i32, i32) {
    %c0_i32 = arith.constant 0 : i32
    %c0_i32_0 = arith.constant 0 : i32
    %c0_i32_1 = arith.constant 0 : i32
    return %c0_i32, %c0_i32_0 : i32, i32
  }
  func.func @transform_3(%arg0: i32) -> (i32, i32) {
    %c0_i32 = arith.constant 0 : i32
    %c0_i32_0 = arith.constant 0 : i32
    %c0_i32_1 = arith.constant 0 : i32
    return %c0_i32, %c0_i32_0 : i32, i32
  }
  func.func @transform_4(%arg0: i32) -> (i32, i32) {
    %c0_i32 = arith.constant 0 : i32
    %c0_i32_0 = arith.constant 0 : i32
    %c0_i32_1 = arith.constant 0 : i32
    return %c0_i32, %c0_i32_0 : i32, i32
  }
  func.func @transform_5(%arg0: i32) -> (i32, i32) {
    %c0_i32 = arith.constant 0 : i32
    %c0_i32_0 = arith.constant 0 : i32
    %c0_i32_1 = arith.constant 0 : i32
    return %c0_i32, %c0_i32_0 : i32, i32
  }
  func.func @transform_6(%arg0: i32) -> (i32, i32) {
    %c0_i32 = arith.constant 0 : i32
    %c0_i32_0 = arith.constant 0 : i32
    %c0_i32_1 = arith.constant 0 : i32
    return %c0_i32, %c0_i32_0 : i32, i32
  }
  func.func @transform_7(%arg0: i32) -> (i32, i32) {
    %c0_i32 = arith.constant 0 : i32
    %c0_i32_0 = arith.constant 0 : i32
    %c0_i32_1 = arith.constant 0 : i32
    return %c0_i32, %c0_i32_0 : i32, i32
  }
  func.func @transform_8(%arg0: i32) -> (i32, i32) {
    %c0_i32 = arith.constant 0 : i32
    %c0_i32_0 = arith.constant 0 : i32
    %c0_i32_1 = arith.constant 0 : i32
    return %c0_i32, %c0_i32_0 : i32, i32
  }
  func.func @transform_9(%arg0: i32) -> (i32, i32) {
    %c0_i32 = arith.constant 0 : i32
    %c0_i32_0 = arith.constant 0 : i32
    %c0_i32_1 = arith.constant 0 : i32
    return %c0_i32, %c0_i32_0 : i32, i32
  }
  func.func @transform_10(%arg0: i32) -> (i32, i32) {
    %c0_i32 = arith.constant 0 : i32
    %c0_i32_0 = arith.constant 0 : i32
    %c0_i32_1 = arith.constant 0 : i32
    return %c0_i32, %c0_i32_0 : i32, i32
  }
  func.func @transform_11(%arg0: i32) -> (i32, i32) {
    %c0_i32 = arith.constant 0 : i32
    %c0_i32_0 = arith.constant 0 : i32
    %c0_i32_1 = arith.constant 0 : i32
    return %c0_i32, %c0_i32_0 : i32, i32
  }
  func.func @transform_12(%arg0: i32) -> (i32, i32) {
    %c0_i32 = arith.constant 0 : i32
    %c0_i32_0 = arith.constant 0 : i32
    %c0_i32_1 = arith.constant 0 : i32
    return %c0_i32, %c0_i32_0 : i32, i32
  }
  func.func @transform_13(%arg0: i32) -> (i32, i32) {
    %c0_i32 = arith.constant 0 : i32
    %c0_i32_0 = arith.constant 0 : i32
    return %arg0, %c0_i32 : i32, i32
  }
}

</mosaic_0001>

<bundles_post_ra>
// kernel: tpu_custom_call.1
= control target key start
LH: loop header
LB: loop body
LE: loop exit
PB: predicated region body
PF: predicated region fallthrough
CT: control target
= control target key end

     0   :  { %vm105_vm0 = vcmask 1042432   ;;  %vm106_vm1 = vcmask 1043456   ;;  %v835_v2 = vmov 65535   ;;  %s1083_s0 = inlined_call_operand.vmem [shape: bf16[2,8,87], index: 0, kind: input, shape index: {}]   ;;  %s1084_s1 = inlined_call_operand.vmem [shape: bf16[87,32], index: 1, kind: input, shape index: {}]   ;;  %s1085_s2 = inlined_call_operand.vmem [shape: f32[1,32], index: 2, kind: input, shape index: {}]   ;;  %s1086_s3 = inlined_call_operand.vmem [shape: bf16[96,32], index: 3, kind: input, shape index: {}]   ;;  %s1087_s4 = inlined_call_operand.vmem [shape: f32[1,32], index: 4, kind: input, shape index: {}]   ;;  %s1088_s5 = inlined_call_operand.vmem [shape: bf16[96,64], index: 5, kind: input, shape index: {}]   ;;  %s1089_s6 = inlined_call_operand.vmem [shape: f32[1,64], index: 6, kind: input, shape index: {}]   ;;  %s1090_s7 = inlined_call_operand.vmem [shape: bf16[128,64], index: 7, kind: input, shape index: {}]   ;;  %s1091_s8 = inlined_call_operand.vmem [shape: f32[1,64], index: 8, kind: input, shape index: {}]   ;;  %s1092_s9 = inlined_call_operand.vmem [shape: bf16[64,64], index: 9, kind: input, shape index: {}]   ;;  %s1093_s10 = inlined_call_operand.vmem [shape: f32[1,64], index: 10, kind: input, shape index: {}]   ;;  %s1094_s11 = inlined_call_operand.vmem [shape: bf16[64,128], index: 11, kind: input, shape index: {}]   ;;  %s1095_s12 = inlined_call_operand.vmem [shape: f32[1,128], index: 12, kind: input, shape index: {}]   ;;  %s1096_s13 = inlined_call_operand.hbm [shape: f32[2,128], index: 13, kind: output, shape index: {}]  }
   0x1   :  { %v58_v0 = vld [vmem:[%s1084_s1 + $0x28] sm:$0xf]  ;;  %v107_v3 = vsel %vm105_vm0, 4294967295, %v835_v2 }
   0x2   :  { %v89_v1 = vunpack.c.l.b16 %v58_v0  ;;  %v108_v4 = vsel %vm106_vm1, %v107_v3, 0 }
   0x4   :  { %v95_v5 = vpack.c.b16 %v89_v1, %v89_v1 }
   0x6   :  { %v110_v6 = vand.u32 %v108_v4, %v95_v5 }
   0x7   :  { %18 = vsyncpa [#allocation3], 0  ;;  %v765_v7 = vld [vmem:[%s1084_s1 + $0x20] sm:$0xff]  ;;  %v764_v8 = vld [vmem:[%s1084_s1 + $0x18] sm:$0xff]  ;;  %vm101_vm2 = vcmask 711680   ;;  %vm144_vm3 = vcmask 1042434  }
   0x8   :  { %114 = vmatpush.bf16.msra.mxu0 %v110_v6  ;;  %v763_v9 = vld [vmem:[%s1084_s1 + $0x10] sm:$0xff]  ;;  %v762_v10 = vld [vmem:[%s1084_s1 + $0x8] sm:$0xff]  ;;  %v761_v11 = vld [vmem:[%s1084_s1] sm:$0xff]  ;;  %vm163_vm4 = vcmask 1041409   ;;  %vm146_vm5 = vcmask 1043459   ;;  %s837_s1 = smov 64  }
   0x9   :  { %v760_v12 = vld [vmem:[%s1083_s0] sm:$0xff]  ;;  %v771_v13 = vld [vmem:[%s1086_s3 + $0x28] sm:$0xff]  ;;  %s836_s0 = smov 32   ;;  %v769_v62 = vld [vmem:[%s1086_s3 + $0x18] sm:$0xff]  ;;  %vm152_vm6 = vcmask 1040384   ;;  %vm190_vm7 = vcmask 261120  }
   0xa   :  { %262 = vmatpush.bf16.msra.mxu1 %v771_v13  ;;  %v803_v14 = vld [vmem:[%s1085_s2] ss:$0 sm:$0xff]  ;;  %v768_v63 = vld [vmem:[%s1086_s3 + $0x10] sm:$0xff]  ;;  %v767_v0 = vld [vmem:[%s1086_s3 + $0x8] sm:$0xff]  ;;  %vm193_vm8 = vcmask 523264   ;;  %vm256_vm9 = vcmask 785408  }
   0xb   :  { %v770_v61 = vld [vmem:[%s1086_s3 + $0x20] sm:$0xff]  ;;  %s838_s21 = smov [#allocation2]  }
   0xc   :  { %115 = vmatpush.bf16.msra.mxu0 %v765_v7  ;;  %v766_v1 = vld [vmem:[%s1086_s3] sm:$0xff]  ;;  %s608_s22 = sshll.u32 %s838_s21, 4  ;;  %s609_s22 = int_to_ptr.vmem [resolvable:$true] %s608_s22 }
   0xe   :  { %263 = vmatpush.bf16.msra.mxu1 %v770_v61 }
  0x10   :  { %116 = vmatpush.bf16.msra.mxu0 %v764_v8 }
  0x12   :  { %264 = vmatpush.bf16.msra.mxu1 %v769_v62 }
  0x14   :  { %117 = vmatpush.bf16.msra.mxu0 %v763_v9 }
  0x16   :  { %265 = vmatpush.bf16.msra.mxu1 %v768_v63 }
  0x18   :  { %118 = vmatpush.bf16.msra.mxu0 %v762_v10 }
  0x1a   :  { %266 = vmatpush.bf16.msra.mxu1 %v767_v0 }
  0x1c   :  { %119 = vmatpush.bf16.msra.mxu0 %v761_v11 }
  0x1e   :  { %267 = vmatpush.bf16.msra.mxu1 %v766_v1 }
  0x1f   :  { %643 = vmatmul.msk.bf16.vlgmr.msra.gmra.mxu0 %vm101_vm2, %v760_v12 }
  0x9c   :  { %v121_v15 = vpop.f32.mrf.mxu0 }
  0x9d   :  { %v122_v16 = vadd.f32 %v803_v14, %v121_v15 }
  0x9f   :  { %v126_v17 = vmul.f32 0.02, %v122_v16 }
  0xa1   :  { %v128_v18 = vmax.f32 %v122_v16, %v126_v17 }
  0xa3   :  { %v132_v19 = vrot.slane %v128_v18, 2  ;;  %v133_v20 = vrot.slane %v128_v18, 4  ;;  %v134_v21 = vrot.slane %v128_v18, 6  ;;  %v155_v24 = vperm.slane %v128_v18, 0 }
  0xa4   :  { %v123_v22 = vpop.f32.mrf.mxu0  ;;  %v138_v27 = vperm.slane %v128_v18, 1 }
  0xa5   :  { %v124_v23 = vadd.f32 %v803_v14, %v123_v22  ;;  %v156_v25 = vperm.slane %v132_v19, 0  ;;  %v157_v26 = vperm.slane %v133_v20, 0  ;;  %v139_v28 = vperm.slane %v132_v19, 1  ;;  %v804_v14 = vld [vmem:[%s1087_s4] ss:$0 sm:$0xff] }
  0xa6   :  { %v140_v29 = vperm.slane %v133_v20, 1  ;;  %v158_v31 = vperm.slane %v134_v21, 0  ;;  %v176_v34 = vperm.slane %v134_v21, 1 }
  0xa7   :  { %v127_v30 = vmul.f32 0.02, %v124_v23  ;;  %v164_v32 = vsel %vm163_vm4, %v156_v25, %v155_v24  ;;  %v178_v35 = vsel %vm163_vm4, %v139_v28, %v138_v27  ;;  %v145_v36 = vsel %vm144_vm3, %v139_v28, %v138_v27 }
  0xa8   :  { %v165_v33 = vsel %vm144_vm3, %v157_v26, %v164_v32  ;;  %v179_v39 = vsel %vm144_vm3, %v140_v29, %v178_v35  ;;  %v147_v40 = vsel %vm146_vm5, %v140_v29, %v145_v36  ;;  %v777_v35 = vld [vmem:[%s1088_s5 + $0x28] sm:$0xff]  ;;  %v776_v36 = vld [vmem:[%s1088_s5 + $0x20] sm:$0xff] }
  0xa9   :  { %v129_v37 = vmax.f32 %v124_v23, %v127_v30  ;;  %v166_v38 = vsel %vm146_vm5, %v158_v31, %v165_v33  ;;  %v180_v41 = vsel %vm146_vm5, %v176_v34, %v179_v39  ;;  %v153_v3 = vsel %vm152_vm6, 0.0, %v147_v40  ;;  %375 = vmatpush.bf16.msra.mxu2 %v777_v35  ;;  %v773_v39 = vld [vmem:[%s1088_s5 + $0x8] sm:$0xff]  ;;  %v772_v40 = vld [vmem:[%s1088_s5] sm:$0xff] }
  0xaa   :  { %170 = vrot.lane.b32.xlu0 %v166_v38, %s836_s0  ;;  %184 = vrot.lane.b32.xlu1 %v180_v41, %s837_s1  ;;  %v774_v38 = vld [vmem:[%s1088_s5 + $0x10] sm:$0xff] }
  0xab   :  { %v135_v42 = vrot.slane %v129_v37, 2  ;;  %v136_v43 = vrot.slane %v129_v37, 4  ;;  %v137_v44 = vrot.slane %v129_v37, 6  ;;  %v159_v45 = vperm.slane %v129_v37, 0 }
  0xac   :  { %v141_v48 = vperm.slane %v129_v37, 1  ;;  %v775_v37 = vld [vmem:[%s1088_s5 + $0x18] sm:$0xff] }
  0xad   :  { %v160_v46 = vperm.slane %v135_v42, 0  ;;  %v161_v47 = vperm.slane %v136_v43, 0  ;;  %v142_v49 = vperm.slane %v135_v42, 1  ;;  %v162_v50 = vperm.slane %v137_v44, 0  ;;  %376 = vmatpush.bf16.msra.mxu2 %v776_v36 }
  0xae   :  { %v143_v51 = vperm.slane %v136_v43, 1  ;;  %v177_v53 = vperm.slane %v137_v44, 1 }
  0xaf   :  { %v167_v52 = vsel %vm163_vm4, %v160_v46, %v159_v45  ;;  %v181_v54 = vsel %vm163_vm4, %v142_v49, %v141_v48  ;;  %v148_v55 = vsel %vm144_vm3, %v142_v49, %v141_v48 }
  0xb0   :  { %v168_v56 = vsel %vm144_vm3, %v161_v47, %v167_v52  ;;  %v182_v57 = vsel %vm144_vm3, %v143_v51, %v181_v54  ;;  %v149_v58 = vsel %vm146_vm5, %v143_v51, %v148_v55  ;;  %v784_v54 = vld [vmem:[%s1090_s7 + $0x30] sm:$0xff]  ;;  %v783_v55 = vld [vmem:[%s1090_s7 + $0x28] sm:$0xff] }
  0xb1   :  { %v169_v59 = vsel %vm146_vm5, %v162_v50, %v168_v56  ;;  %v183_v60 = vsel %vm146_vm5, %v177_v53, %v182_v57  ;;  %v154_v7 = vsel %vm152_vm6, 0.0, %v149_v58  ;;  %377 = vmatpush.bf16.msra.mxu2 %v775_v37  ;;  %v785_v53 = vld [vmem:[%s1090_s7 + $0x38] sm:$0xff]  ;;  %v782_v56 = vld [vmem:[%s1090_s7 + $0x20] sm:$0xff] }
  0xb2   :  { %172 = vrot.lane.b32.xlu0 %v169_v59, %s836_s0  ;;  %186 = vrot.lane.b32.xlu1 %v183_v60, %s837_s1  ;;  %v781_v57 = vld [vmem:[%s1090_s7 + $0x18] sm:$0xff]  ;;  %v805_v58 = vld [vmem:[%s1089_s6] ss:$0 sm:$0xff]  ;;  %s610_s6 = sshll.u32 %s1096_s13, 4  ;;  %s611_s6 = int_to_ptr.hbm [resolvable:$true] %s610_s6 }
  0xb3   :  { %479 = vmatpush.bf16.msra.mxu3 %v785_v53 }
  0xb5   :  { %378 = vmatpush.bf16.msra.mxu2 %v774_v38 }
  0xb7   :  { %480 = vmatpush.bf16.msra.mxu3 %v784_v54 }
  0xb9   :  { %379 = vmatpush.bf16.msra.mxu2 %v773_v39 }
  0xbb   :  { %481 = vmatpush.bf16.msra.mxu3 %v783_v55 }
  0xbd   :  { %380 = vmatpush.bf16.msra.mxu2 %v772_v40 }
  0xbf   :  { %482 = vmatpush.bf16.msra.mxu3 %v782_v56 }
  0xc3   :  { %483 = vmatpush.bf16.msra.mxu3 %v781_v57 }
 0x11c   :  { %v171_v2 = vpop.permute.xlu0 %170  ;;  %v185_v5 = vpop.permute.xlu1 %184 }
 0x11d   :  { %v191_v4 = vsel %vm190_vm7, %v153_v3, %v171_v2 }
 0x11e   :  { %v194_v6 = vsel %vm193_vm8, %v191_v4, %v185_v5  ;;  %v780_v4 = vld [vmem:[%s1090_s7 + $0x10] sm:$0xff]  ;;  %v779_v5 = vld [vmem:[%s1090_s7 + $0x8] sm:$0xff] }
 0x11f   :  { %198 = vst [vmem:[#allocation1] ss:$2 sm:$0xff] %v194_v6  ;;  %484 = vmatpush.bf16.msra.mxu3 %v780_v4  ;;  %v778_v6 = vld [vmem:[%s1090_s7] sm:$0xff] }
 0x123   :  { %485 = vmatpush.bf16.msra.mxu3 %v779_v5 }
 0x124   :  { %v173_v8 = vpop.permute.xlu0 %172  ;;  %v187_v10 = vpop.permute.xlu1 %186 }
 0x125   :  { %v192_v9 = vsel %vm190_vm7, %v154_v7, %v173_v8  ;;  %v789_v7 = vld [vmem:[%s1092_s9 + $0x18] sm:$0xff]  ;;  %v788_v8 = vld [vmem:[%s1092_s9 + $0x10] sm:$0xff] }
 0x126   :  { %v195_v11 = vsel %vm193_vm8, %v192_v9, %v187_v10  ;;  %538 = vmatpush.bf16.msrb.mxu0 %v789_v7 }
 0x127   :  { %200 = vst [vmem:[#allocation1 + $0x1] ss:$2 sm:$0xff] %v195_v11  ;;  %486 = vmatpush.bf16.msra.mxu3 %v778_v6 }
 0x12a   :  { %539 = vmatpush.bf16.msrb.mxu0 %v788_v8 }
 0x12e   :  { %v201_v12 = vld.sshfl [vmem:[#allocation1] sm:$0xff pattern:$0x75316420] }
 0x12f   :  { %v203_v13 = vpack.c.bf16 %v201_v12, %v201_v12 }
 0x131   :  { %668 = vmatmul.msk.bf16.vlgmr.msra.gmra.mxu1 %vm256_vm9, %v203_v13 }
 0x1ae   :  { %v269_v15 = vpop.f32.mrf.mxu1 }
 0x1af   :  { %v270_v16 = vadd.f32 %v804_v14, %v269_v15 }
 0x1b1   :  { %v273_v17 = vmul.f32 0.02, %v270_v16 }
 0x1b3   :  { %v274_v18 = vmax.f32 %v270_v16, %v273_v17 }
 0x1b5   :  { %v277_v19 = vrot.slane %v274_v18, 4  ;;  %v278_v20 = vrot.slane %v274_v18, 6  ;;  %v276_v21 = vrot.slane %v274_v18, 2  ;;  %v294_v23 = vperm.slane %v274_v18, 1 }
 0x1b6   :  { %v271_v22 = vpop.f32.mrf.mxu1  ;;  %v282_v24 = vperm.slane %v274_v18, 0  ;;  %v280_v43 = vsel %vm152_vm6, 0.0, %v274_v18 }
 0x1b7   :  { %v296_v25 = vperm.slane %v277_v19, 1  ;;  %v297_v26 = vperm.slane %v278_v20, 1  ;;  %v295_v27 = vperm.slane %v276_v21, 1  ;;  %v283_v28 = vperm.slane %v276_v21, 0  ;;  %v787_v21 = vld [vmem:[%s1092_s9 + $0x8] sm:$0xff]  ;;  %v786_v22 = vld [vmem:[%s1092_s9] sm:$0xff] }
 0x1b8   :  { %v284_v32 = vperm.slane %v277_v19, 0  ;;  %v285_v33 = vperm.slane %v278_v20, 0  ;;  %v281_v44 = vsel %vm152_vm6, 0.0, %v277_v19  ;;  %540 = vmatpush.bf16.msrb.mxu0 %v787_v21 }
 0x1b9   :  { %v299_v29 = vsel %vm163_vm4, %v297_v26, %v296_v25  ;;  %v298_v30 = vsel %vm163_vm4, %v295_v27, %v294_v23  ;;  %v286_v31 = vsel %vm163_vm4, %v283_v28, %v282_v24  ;;  %v793_v23 = vld [vmem:[%s1094_s11 + $0x18] sm:$0xff]  ;;  %v792_v24 = vld [vmem:[%s1094_s11 + $0x10] sm:$0xff]  ;;  %v806_v25 = vld [vmem:[%s1091_s8] ss:$0 sm:$0xff] }
 0x1ba   :  { %302 = vrot.lane.b32.xlu1 %v299_v29, %s837_s1  ;;  %300 = vrot.lane.b32.xlu0 %v298_v30, %s837_s1  ;;  %v287_v34 = vsel %vm163_vm4, %v285_v33, %v284_v32  ;;  %v791_v32 = vld [vmem:[%s1094_s11 + $0x8] sm:$0xff]  ;;  %v790_v33 = vld [vmem:[%s1094_s11] sm:$0xff] }
 0x1bb   :  { %288 = vrot.lane.b32.xlu2 %v286_v31, %s836_s0  ;;  %593 = vmatpush.bf16.msrb.mxu1 %v793_v23 }
 0x1bc   :  { %541 = vmatpush.bf16.msrb.mxu0 %v786_v22 }
 0x1bf   :  { %594 = vmatpush.bf16.msrb.mxu1 %v792_v24 }
 0x1c3   :  { %290 = vrot.lane.b32.xlu2 %v287_v34, %s836_s0  ;;  %595 = vmatpush.bf16.msrb.mxu1 %v791_v32  ;;  %v807_v34 = vld [vmem:[%s1093_s10] ss:$0 sm:$0xff] }
 0x1c7   :  { %596 = vmatpush.bf16.msrb.mxu1 %v790_v33 }
 0x215   :  { %v289_v41 = vpop.permute.xlu2 %288 }
 0x216   :  { %v306_v45 = vsel %vm190_vm7, %v280_v43, %v289_v41  ;;  %v808_v41 = vld [vmem:[%s1095_s12] ss:$0 sm:$0xff] }
 0x21d   :  { %v291_v42 = vpop.permute.xlu2 %290 }
 0x21e   :  { %v307_v46 = vsel %vm190_vm7, %v281_v44, %v291_v42 }
 0x22c   :  { %v303_v47 = vpop.permute.xlu1 %302  ;;  %v301_v48 = vpop.permute.xlu0 %300 }
 0x22d   :  { %v309_v49 = vsel %vm193_vm8, %v307_v46, %v303_v47  ;;  %v308_v50 = vsel %vm193_vm8, %v306_v45, %v301_v48 }
 0x22e   :  { %314 = vst [vmem:[#allocation1 + $0x1] ss:$4 sm:$0xff] %v309_v49 }
 0x22f   :  { %312 = vst [vmem:[#allocation1] ss:$4 sm:$0xff] %v308_v50 }
 0x236   :  { %v315_v51 = vld.sshfl [vmem:[#allocation1] sm:$0xff pattern:$0x73625140] }
 0x237   :  { %v317_v52 = vpack.c.bf16 %v315_v51, %v315_v51 }
 0x239   :  { %693 = vmatmul.msk.bf16.vlgmr.msra.gmra.mxu2 %vm256_vm9, %v317_v52 }
 0x2bc   :  { %v382_v59 = vpop.f32.mrf.mxu2 }
 0x2bd   :  { %v383_v60 = vadd.f32 %v805_v58, %v382_v59 }
 0x2bf   :  { %v386_v61 = vmul.f32 0.02, %v383_v60 }
 0x2c1   :  { %v387_v62 = vmax.f32 %v383_v60, %v386_v61 }
 0x2c3   :  { %v389_v63 = vrot.slane %v387_v62, 2  ;;  %v391_v1 = vperm.slane %v387_v62, 1 }
 0x2c4   :  { %v384_v0 = vpop.f32.mrf.mxu2 }
 0x2c5   :  { %v392_v2 = vperm.slane %v389_v63, 1 }
 0x2c7   :  { %v798_v3 = vpack.i.bf16 %v391_v1, %v392_v2 }
 0x2c9   :  { %799 = vrot.lane.b32.xlu2 %v798_v3, %s837_s1 }
 0x323   :  { %v800_v9 = vpop.permute.xlu2 %799 }
 0x324   :  { %v802_v10 = vunpack.i.h.bf16 %v800_v9  ;;  %v801_v11 = vunpack.i.l.bf16 %v800_v9 }
 0x326   :  { %v399_v12 = vsel %vm193_vm8, %v387_v62, %v802_v10  ;;  %v400_v13 = vsel %vm193_vm8, %v389_v63, %v801_v11 }
 0x327   :  { %v401_v14 = vpack.c.bf16 %v399_v12, %v399_v12  ;;  %v402_v15 = vpack.c.bf16 %v400_v13, %v400_v13 }
 0x329   :  { %v426_v16 = vunpack.c.l.b16 %v402_v15  ;;  %v425_v17 = vunpack.c.l.b16 %v401_v14 }
 0x32b   :  { %v427_v18 = vrot.slane %v426_v16, 7 }
 0x32d   :  { %v428_v19 = vsel %vm163_vm4, %v427_v18, %v425_v17 }
 0x32e   :  { %v429_v20 = vpack.c.b16 %v428_v19, %v428_v19 }
 0x330   :  { %487 = vmatmul.bf16.vlgmr.msra.gmra.mxu3 %v429_v20 }
 0x3b3   :  { %v488_v26 = vpop.f32.mrf.mxu3 }
 0x3b4   :  { %v489_v27 = vadd.f32 %v806_v25, %v488_v26 }
 0x3b6   :  { %v492_v28 = vmul.f32 0.02, %v489_v27 }
 0x3b8   :  { %v493_v29 = vmax.f32 %v489_v27, %v492_v28 }
 0x3ba   :  { %v494_v30 = vpack.c.bf16 %v493_v29, %v493_v29 }
 0x3bb   :  { %v490_v31 = vpop.f32.mrf.mxu3 }
 0x3bc   :  { %742 = vmatmul.msk.bf16.vlgmr.msrb.gmra.mxu0 %vm193_vm8, %v494_v30 }
 0x439   :  { %v543_v35 = vpop.f32.mrf.mxu0 }
 0x43a   :  { %v544_v36 = vadd.f32 %v807_v34, %v543_v35 }
 0x43c   :  { %v547_v37 = vmul.f32 0.02, %v544_v36 }
 0x43e   :  { %v548_v38 = vmax.f32 %v544_v36, %v547_v37 }
 0x440   :  { %v549_v39 = vpack.c.bf16 %v548_v38, %v548_v38 }
 0x441   :  { %v545_v40 = vpop.f32.mrf.mxu0 }
 0x442   :  { %759 = vmatmul.msk.bf16.vlgmr.msrb.gmra.mxu1 %vm193_vm8, %v549_v39 }
 0x4bf   :  { %v598_v42 = vpop.f32.mrf.mxu1 }
 0x4c0   :  { %v599_v43 = vadd.f32 %v808_v41, %v598_v42 }
 0x4c2   :  { %602 = vst [vmem:[#allocation2] sm:$0x3] %v599_v43 }
 0x4c3   :  { %613 = dma.vmem_to_hbm [thread:$0]  %s609_s22, 32, %s611_s6, [#allocation3]  }
 0x4c7   :  { %v600_v44 = vpop.f32.mrf.mxu1 }
 0x4c8   :  { %833 = dma.done.wait [#allocation3], 32  }
 0x4c9   :  { %834 = vsyncadd [#allocation3], 4294967264 }
 0x4ca   :  { %618 = vsyncpa [#allocation3], 1 }

</bundles_post_ra>
